<compile_context>
chip_gen: v7x
topology: tpu7x:2x2x1
jax: 0.10.0
libtpu: 0.0.40
codegen_flags: <defaults>
</compile_context>

<pallas_src>
import functools

import jax
import jax.numpy as jnp
from jax import lax
from jax.experimental import pallas as pl
from jax.experimental.pallas import tpu as pltpu


def _combined_loss_kernel(x_ref, t_ref, inter_ref, sump_ref, pres_ref, ce_ref,
                          *, hw, tile_hw, needs_mask):
    # Per-batch-element partial accumulators; zero them on the first pixel tile.
    @pl.when(pl.program_id(1) == 0)
    def _():
        inter_ref[...] = jnp.zeros_like(inter_ref)
        sump_ref[...] = jnp.zeros_like(sump_ref)
        pres_ref[...] = jnp.zeros_like(pres_ref)
        ce_ref[...] = jnp.zeros_like(ce_ref)

    x = x_ref[...].astype(jnp.float32)            # (C, T) logits tile
    t = t_ref[...]                                # (1, T) int32 targets tile
    C, T = x.shape

    cls = lax.broadcasted_iota(jnp.int32, (C, 1), 0)   # (C, 1) class ids
    oh_b = cls == t                                    # (C, T) bool one-hot

    if needs_mask:
        # Last tile overhangs the array; OOB block content is undefined, so
        # mask by global pixel index (NaN-safe via where, not multiply).
        base = pl.program_id(1) * tile_hw
        lane = lax.broadcasted_iota(jnp.int32, (1, T), 1)
        vb = (base + lane) < hw                        # (1, T) bool
        valid = vb.astype(jnp.float32)
        x = jnp.where(vb, x, 0.0)
        oh_b = jnp.logical_and(oh_b, vb)

    # Numerically-stable softmax pieces; one EUP exp on the big (C, T) slab.
    m = jnp.max(x, axis=0, keepdims=True)         # (1, T) sublane reduce
    z = x - m
    e = jnp.exp(z)                                # (C, T)
    s = jnp.sum(e, axis=0, keepdims=True)         # (1, T)

    # Exact division only on the (1, T) row; broadcast-multiply onto (C, T).
    inv = (valid / s) if needs_mask else (1.0 / s)
    p = e * inv                                   # softmax probs; 0 on overhang
    oh = oh_b.astype(jnp.float32)                 # (C, T); 0 on overhang

    inter_ref[...] += jnp.sum(p * oh, axis=1, keepdims=True)    # (C, 1)
    sump_ref[...] += jnp.sum(p, axis=1, keepdims=True)          # (C, 1)
    pres_ref[...] += jnp.sum(oh, axis=1, keepdims=True)         # (C, 1)

    # CE sum over valid pixels of  log(sum_c exp(z)) - z[target]
    logs = jnp.log(s)
    if needs_mask:
        logs = logs * valid
    ce_ref[...] += (jnp.sum(logs, axis=1, keepdims=True)
                    - jnp.sum(z * oh, axis=(0, 1), keepdims=True))   # (1, 1)


def _pick_tile_hw(hw, num_classes, max_tile, vmem_budget_bytes=10 * 1024 * 1024):
    """Largest 128-multiple pixel tile <= max_tile whose working set
    (double-buffered logits+targets blocks plus ~6 f32 (C,T) temporaries)
    stays inside a conservative VMEM budget."""
    bytes_per_lane = 4 * (2 * (num_classes + 1) + 6 * num_classes)
    cap = vmem_budget_bytes // bytes_per_lane
    tile = max(128, (min(max_tile, cap) // 128) * 128)
    hw_pad128 = ((hw + 127) // 128) * 128
    return hw_pad128 if hw_pad128 <= tile else tile


@functools.partial(jax.jit,
                   static_argnames=("weight_dice", "weight_bce", "max_tile"))
def combined_loss(logits, targets, weight_dice=0.5, weight_bce=0.5,
                  max_tile=32768):
    """logits: (N, C, H, W) float, targets: (N, H, W) integer class labels.

    Multiclass path of CombinedLoss (num_classes > 1):
      weight_dice * DiceLoss(multiclass, from_logits) + weight_bce * CrossEntropy.
    """
    # TODO(synk): binary branch (num_classes == 1, BCEWithLogitsLoss + binary
    # DiceLoss) of the original module is not implemented; multiclass only.
    N, C, H, W = logits.shape
    HW = H * W
    P = N * HW

    tile_hw = _pick_tile_hw(HW, C, max_tile)
    num_tiles = pl.cdiv(HW, tile_hw)
    needs_mask = (HW % tile_hw) != 0

    x = logits.reshape(N, C, HW)                       # free reshape, no transpose
    t = targets.reshape(N, 1, HW).astype(jnp.int32)

    kernel = functools.partial(_combined_loss_kernel, hw=HW, tile_hw=tile_hw,
                               needs_mask=needs_mask)

    out_shapes = (
        jax.ShapeDtypeStruct((N, C, 1), jnp.float32),   # per-batch intersection
        jax.ShapeDtypeStruct((N, C, 1), jnp.float32),   # per-batch sum of probs
        jax.ShapeDtypeStruct((N, C, 1), jnp.float32),   # per-batch class presence
        jax.ShapeDtypeStruct((N, 1, 1), jnp.float32),   # per-batch CE-loss sum
    )

    inter_p, sump_p, pres_p, ce_p = pl.pallas_call(
        kernel,
        out_shape=out_shapes,
        grid_spec=pltpu.PrefetchScalarGridSpec(
            num_scalar_prefetch=0,
            grid=(N, num_tiles),
            in_specs=[
                pl.BlockSpec((None, C, tile_hw), lambda n, i: (n, 0, i)),
                pl.BlockSpec((None, 1, tile_hw), lambda n, i: (n, 0, i)),
            ],
            out_specs=[
                pl.BlockSpec((None, C, 1), lambda n, i: (n, 0, 0)),
                pl.BlockSpec((None, C, 1), lambda n, i: (n, 0, 0)),
                pl.BlockSpec((None, C, 1), lambda n, i: (n, 0, 0)),
                pl.BlockSpec((None, 1, 1), lambda n, i: (n, 0, 0)),
            ],
        ),
        compiler_params=pltpu.CompilerParams(
            dimension_semantics=("parallel", "arbitrary")),
    )(x, t)

    # Combine per-batch partials (tiny, plain JAX glue).
    inter = jnp.sum(inter_p[:, :, 0], axis=0)          # (C,)
    sum_p = jnp.sum(sump_p[:, :, 0], axis=0)           # (C,)
    present = jnp.sum(pres_p[:, :, 0], axis=0)         # (C,)
    ce_sum = jnp.sum(ce_p)

    # smp.losses.DiceLoss defaults: smooth=0.0, eps=1e-7, log_loss=False
    eps = 1e-7
    card = sum_p + present
    dice_score = (2.0 * inter) / jnp.maximum(card, eps)
    dice_loss = jnp.mean((1.0 - dice_score) * (present > 0).astype(jnp.float32))

    # TODO(synk): PyTorch CrossEntropyLoss's default ignore_index=-100 is not
    # handled; targets are assumed to be valid class ids in [0, C).
    ce_loss = ce_sum / float(P)                        # mean over all pixels

    return weight_dice * dice_loss + weight_bce * ce_loss


def _reference_combined_loss(logits, targets, weight_dice=0.5, weight_bce=0.5):
    """Pure-JAX reference mirroring smp DiceLoss(multiclass) + nn.CrossEntropyLoss."""
    N, C, H, W = logits.shape
    logp = jax.nn.log_softmax(logits, axis=1)
    p = jnp.exp(logp)
    oh = jax.nn.one_hot(targets, C, axis=1, dtype=jnp.float32)   # (N, C, H, W)
    dims = (0, 2, 3)
    inter = jnp.sum(p * oh, axis=dims)
    card = jnp.sum(p + oh, axis=dims)
    dice = (2.0 * inter) / jnp.maximum(card, 1e-7)
    mask = (jnp.sum(oh, axis=dims) > 0).astype(jnp.float32)
    dice_loss = jnp.mean((1.0 - dice) * mask)
    ce_loss = -jnp.mean(jnp.sum(logp * oh, axis=1))
    return weight_dice * dice_loss + weight_bce * ce_loss


if __name__ == "__main__":
    # CombinedLoss(num_classes=4, weight_dice=0.5, weight_bce=0.5); no learnable params.
    N, C, H, W = 2, 4, 16, 16
    key = jax.random.PRNGKey(0)
    k1, k2 = jax.random.split(key)
    logits = jax.random.normal(k1, (N, C, H, W), dtype=jnp.float32)
    targets = jax.random.randint(k2, (N, H, W), 0, C, dtype=jnp.int32)

    loss = combined_loss(logits, targets)
    jax.block_until_ready(loss)

    ref = _reference_combined_loss(logits, targets)
    assert jnp.allclose(loss, ref, rtol=1e-4, atol=1e-5), (loss, ref)

    print("KERNEL_OK")
</pallas_src>

<mosaic_0001>
module attributes {stable_mosaic.version = 11 : i64} {
  func.func @_combined_loss_kernel(%arg0: i32, %arg1: i32, %arg2: memref<1x4x256xf32, #tpu.memory_space<vmem>>, %arg3: memref<1x1x256xi32, #tpu.memory_space<vmem>>, %arg4: memref<1x4x1xf32, #tpu.memory_space<vmem>>, %arg5: memref<1x4x1xf32, #tpu.memory_space<vmem>>, %arg6: memref<1x4x1xf32, #tpu.memory_space<vmem>>, %arg7: memref<1x1x1xf32, #tpu.memory_space<vmem>>) attributes {dimension_semantics = [#tpu.dimension_semantics<parallel>, #tpu.dimension_semantics<arbitrary>], iteration_bounds = array<i64: 2, 1>, scalar_prefetch = 0 : i64, scratch_operands = 0 : i64, tpu.core_type = #tpu.core_type<tc>, window_params = [{transform_indices = @transform_0, window_bounds = array<i64: 1, 4, 256>}, {transform_indices = @transform_1, window_bounds = array<i64: 1, 1, 256>}, {transform_indices = @transform_2, window_bounds = array<i64: 1, 4, 1>}, {transform_indices = @transform_3, window_bounds = array<i64: 1, 4, 1>}, {transform_indices = @transform_4, window_bounds = array<i64: 1, 4, 1>}, {transform_indices = @transform_5, window_bounds = array<i64: 1, 1, 1>}]} {
    %c0_i32 = arith.constant 0 : i32
    %0 = arith.cmpi eq, %arg1, %c0_i32 : i32
    %1 = arith.extui %0 : i1 to i32
    %c0_i32_0 = arith.constant 0 : i32
    %2 = arith.cmpi ne, %1, %c0_i32_0 : i32
    scf.if %2 {
      %cst_37 = arith.constant 0.000000e+00 : f32
      %65 = vector.broadcast %cst_37 : f32 to vector<4x1xf32>
      %c0_38 = arith.constant 0 : index
      %c0_39 = arith.constant 0 : index
      %c0_40 = arith.constant 0 : index
      %66 = vector.load %arg4[%c0_38, %c0_39, %c0_40] : memref<1x4x1xf32, #tpu.memory_space<vmem>>, vector<1x4x1xf32>
      %67 = vector.shape_cast %66 : vector<1x4x1xf32> to vector<4x1xf32>
      %68 = vector.shape_cast %65 : vector<4x1xf32> to vector<1x4x1xf32>
      tpu.vector_store %arg4[%c0_38, %c0_39, %c0_40], %68 {strides = array<i32>} : memref<1x4x1xf32, #tpu.memory_space<vmem>>, vector<1x4x1xf32>,
      %cst_41 = arith.constant 0.000000e+00 : f32
      %69 = vector.broadcast %cst_41 : f32 to vector<4x1xf32>
      %c0_42 = arith.constant 0 : index
      %c0_43 = arith.constant 0 : index
      %c0_44 = arith.constant 0 : index
      %70 = vector.load %arg5[%c0_42, %c0_43, %c0_44] : memref<1x4x1xf32, #tpu.memory_space<vmem>>, vector<1x4x1xf32>
      %71 = vector.shape_cast %70 : vector<1x4x1xf32> to vector<4x1xf32>
      %72 = vector.shape_cast %69 : vector<4x1xf32> to vector<1x4x1xf32>
      tpu.vector_store %arg5[%c0_42, %c0_43, %c0_44], %72 {strides = array<i32>} : memref<1x4x1xf32, #tpu.memory_space<vmem>>, vector<1x4x1xf32>,
      %cst_45 = arith.constant 0.000000e+00 : f32
      %73 = vector.broadcast %cst_45 : f32 to vector<4x1xf32>
      %c0_46 = arith.constant 0 : index
      %c0_47 = arith.constant 0 : index
      %c0_48 = arith.constant 0 : index
      %74 = vector.load %arg6[%c0_46, %c0_47, %c0_48] : memref<1x4x1xf32, #tpu.memory_space<vmem>>, vector<1x4x1xf32>
      %75 = vector.shape_cast %74 : vector<1x4x1xf32> to vector<4x1xf32>
      %76 = vector.shape_cast %73 : vector<4x1xf32> to vector<1x4x1xf32>
      tpu.vector_store %arg6[%c0_46, %c0_47, %c0_48], %76 {strides = array<i32>} : memref<1x4x1xf32, #tpu.memory_space<vmem>>, vector<1x4x1xf32>,
      %cst_49 = arith.constant 0.000000e+00 : f32
      %77 = vector.broadcast %cst_49 : f32 to vector<1x1xf32>
      %c0_50 = arith.constant 0 : index
      %c0_51 = arith.constant 0 : index
      %c0_52 = arith.constant 0 : index
      %78 = vector.load %arg7[%c0_50, %c0_51, %c0_52] : memref<1x1x1xf32, #tpu.memory_space<vmem>>, vector<1x1x1xf32>
      %79 = vector.shape_cast %78 : vector<1x1x1xf32> to vector<1x1xf32>
      %80 = vector.shape_cast %77 : vector<1x1xf32> to vector<1x1x1xf32>
      tpu.vector_store %arg7[%c0_50, %c0_51, %c0_52], %80 {strides = array<i32>} : memref<1x1x1xf32, #tpu.memory_space<vmem>>, vector<1x1x1xf32>,
    } else {
    }
    %c0 = arith.constant 0 : index
    %c0_1 = arith.constant 0 : index
    %c0_2 = arith.constant 0 : index
    %3 = vector.load %arg2[%c0, %c0_1, %c0_2] : memref<1x4x256xf32, #tpu.memory_space<vmem>>, vector<1x4x256xf32>
    %4 = vector.shape_cast %3 : vector<1x4x256xf32> to vector<4x256xf32>
    %c0_3 = arith.constant 0 : index
    %c0_4 = arith.constant 0 : index
    %c0_5 = arith.constant 0 : index
    %5 = vector.load %arg3[%c0_3, %c0_4, %c0_5] : memref<1x1x256xi32, #tpu.memory_space<vmem>>, vector<1x1x256xi32>
    %6 = vector.shape_cast %5 : vector<1x1x256xi32> to vector<1x256xi32>
    %7 = tpu.iota {dimensions = array<i32: 0>} : vector<4x1xi32>
    %8 = vector.broadcast %7 : vector<4x1xi32> to vector<4x256xi32>
    %9 = vector.broadcast %6 : vector<1x256xi32> to vector<4x256xi32>
    %10 = arith.cmpi eq, %8, %9 : vector<4x256xi32>
    %cst = arith.constant dense<0xFF800000> : vector<256xf32>
    %11 = vector.multi_reduction <maximumf>, %4, %cst [0] : vector<4x256xf32> to vector<256xf32>
    %12 = vector.shape_cast %11 : vector<256xf32> to vector<1x256xf32>
    %13 = vector.broadcast %12 : vector<1x256xf32> to vector<4x256xf32>
    %14 = arith.subf %4, %13 : vector<4x256xf32>
    %15 = math.exp %14 : vector<4x256xf32>
    %cst_6 = arith.constant dense<0.000000e+00> : vector<256xf32>
    %16 = vector.multi_reduction <add>, %15, %cst_6 [0] : vector<4x256xf32> to vector<256xf32>
    %17 = vector.shape_cast %16 : vector<256xf32> to vector<1x256xf32>
    %cst_7 = arith.constant 1.000000e+00 : f32
    %18 = vector.broadcast %cst_7 : f32 to vector<1x256xf32>
    %19 = arith.divf %18, %17 : vector<1x256xf32>
    %20 = vector.broadcast %19 : vector<1x256xf32> to vector<4x256xf32>
    %21 = arith.mulf %15, %20 : vector<4x256xf32>
    %22 = arith.extui %10 : vector<4x256xi1> to vector<4x256xi32>
    %23 = arith.sitofp %22 : vector<4x256xi32> to vector<4x256xf32>
    %c0_8 = arith.constant 0 : index
    %c0_9 = arith.constant 0 : index
    %c0_10 = arith.constant 0 : index
    %24 = vector.load %arg4[%c0_8, %c0_9, %c0_10] : memref<1x4x1xf32, #tpu.memory_space<vmem>>, vector<1x4x1xf32>
    %25 = vector.shape_cast %24 : vector<1x4x1xf32> to vector<4x1xf32>
    %26 = arith.mulf %21, %23 : vector<4x256xf32>
    %cst_11 = arith.constant dense<0.000000e+00> : vector<4xf32>
    %27 = vector.multi_reduction <add>, %26, %cst_11 [1] : vector<4x256xf32> to vector<4xf32>
    %28 = vector.shape_cast %27 : vector<4xf32> to vector<4x1xf32>
    %29 = arith.addf %25, %28 : vector<4x1xf32>
    %c0_12 = arith.constant 0 : index
    %c0_13 = arith.constant 0 : index
    %c0_14 = arith.constant 0 : index
    %30 = vector.load %arg4[%c0_12, %c0_13, %c0_14] : memref<1x4x1xf32, #tpu.memory_space<vmem>>, vector<1x4x1xf32>
    %31 = vector.shape_cast %30 : vector<1x4x1xf32> to vector<4x1xf32>
    %32 = vector.shape_cast %29 : vector<4x1xf32> to vector<1x4x1xf32>
    tpu.vector_store %arg4[%c0_12, %c0_13, %c0_14], %32 {strides = array<i32>} : memref<1x4x1xf32, #tpu.memory_space<vmem>>, vector<1x4x1xf32>,
    %c0_15 = arith.constant 0 : index
    %c0_16 = arith.constant 0 : index
    %c0_17 = arith.constant 0 : index
    %33 = vector.load %arg5[%c0_15, %c0_16, %c0_17] : memref<1x4x1xf32, #tpu.memory_space<vmem>>, vector<1x4x1xf32>
    %34 = vector.shape_cast %33 : vector<1x4x1xf32> to vector<4x1xf32>
    %cst_18 = arith.constant dense<0.000000e+00> : vector<4xf32>
    %35 = vector.multi_reduction <add>, %21, %cst_18 [1] : vector<4x256xf32> to vector<4xf32>
    %36 = vector.shape_cast %35 : vector<4xf32> to vector<4x1xf32>
    %37 = arith.addf %34, %36 : vector<4x1xf32>
    %c0_19 = arith.constant 0 : index
    %c0_20 = arith.constant 0 : index
    %c0_21 = arith.constant 0 : index
    %38 = vector.load %arg5[%c0_19, %c0_20, %c0_21] : memref<1x4x1xf32, #tpu.memory_space<vmem>>, vector<1x4x1xf32>
    %39 = vector.shape_cast %38 : vector<1x4x1xf32> to vector<4x1xf32>
    %40 = vector.shape_cast %37 : vector<4x1xf32> to vector<1x4x1xf32>
    tpu.vector_store %arg5[%c0_19, %c0_20, %c0_21], %40 {strides = array<i32>} : memref<1x4x1xf32, #tpu.memory_space<vmem>>, vector<1x4x1xf32>,
    %c0_22 = arith.constant 0 : index
    %c0_23 = arith.constant 0 : index
    %c0_24 = arith.constant 0 : index
    %41 = vector.load %arg6[%c0_22, %c0_23, %c0_24] : memref<1x4x1xf32, #tpu.memory_space<vmem>>, vector<1x4x1xf32>
    %42 = vector.shape_cast %41 : vector<1x4x1xf32> to vector<4x1xf32>
    %cst_25 = arith.constant dense<0.000000e+00> : vector<4xf32>
    %43 = vector.multi_reduction <add>, %23, %cst_25 [1] : vector<4x256xf32> to vector<4xf32>
    %44 = vector.shape_cast %43 : vector<4xf32> to vector<4x1xf32>
    %45 = arith.addf %42, %44 : vector<4x1xf32>
    %c0_26 = arith.constant 0 : index
    %c0_27 = arith.constant 0 : index
    %c0_28 = arith.constant 0 : index
    %46 = vector.load %arg6[%c0_26, %c0_27, %c0_28] : memref<1x4x1xf32, #tpu.memory_space<vmem>>, vector<1x4x1xf32>
    %47 = vector.shape_cast %46 : vector<1x4x1xf32> to vector<4x1xf32>
    %48 = vector.shape_cast %45 : vector<4x1xf32> to vector<1x4x1xf32>
    tpu.vector_store %arg6[%c0_26, %c0_27, %c0_28], %48 {strides = array<i32>} : memref<1x4x1xf32, #tpu.memory_space<vmem>>, vector<1x4x1xf32>,
    %49 = math.log %17 : vector<1x256xf32>
    %c0_29 = arith.constant 0 : index
    %c0_30 = arith.constant 0 : index
    %c0_31 = arith.constant 0 : index
    %50 = vector.load %arg7[%c0_29, %c0_30, %c0_31] : memref<1x1x1xf32, #tpu.memory_space<vmem>>, vector<1x1x1xf32>
    %51 = vector.shape_cast %50 : vector<1x1x1xf32> to vector<1x1xf32>
    %cst_32 = arith.constant dense<0.000000e+00> : vector<1xf32>
    %52 = vector.multi_reduction <add>, %49, %cst_32 [1] : vector<1x256xf32> to vector<1xf32>
    %53 = vector.shape_cast %52 : vector<1xf32> to vector<1x1xf32>
    %54 = arith.mulf %14, %23 : vector<4x256xf32>
    %55 = vector.shape_cast %54 : vector<4x256xf32> to vector<1x4x256xf32>
    %cst_33 = arith.constant dense<0.000000e+00> : vector<1xf32>
    %56 = vector.multi_reduction <add>, %55, %cst_33 [1, 2] : vector<1x4x256xf32> to vector<1xf32>
    %57 = vector.shape_cast %56 : vector<1xf32> to vector<1x1x1xf32>
    %58 = vector.extract %57[0, 0, 0] : f32 from vector<1x1x1xf32>
    %59 = vector.broadcast %58 : f32 to vector<1x1xf32>
    %60 = arith.subf %53, %59 : vector<1x1xf32>
    %61 = arith.addf %51, %60 : vector<1x1xf32>
    %c0_34 = arith.constant 0 : index
    %c0_35 = arith.constant 0 : index
    %c0_36 = arith.constant 0 : index
    %62 = vector.load %arg7[%c0_34, %c0_35, %c0_36] : memref<1x1x1xf32, #tpu.memory_space<vmem>>, vector<1x1x1xf32>
    %63 = vector.shape_cast %62 : vector<1x1x1xf32> to vector<1x1xf32>
    %64 = vector.shape_cast %61 : vector<1x1xf32> to vector<1x1x1xf32>
    tpu.vector_store %arg7[%c0_34, %c0_35, %c0_36], %64 {strides = array<i32>} : memref<1x1x1xf32, #tpu.memory_space<vmem>>, vector<1x1x1xf32>,
    return
  }
  func.func @transform_0(%arg0: i32, %arg1: i32) -> (i32, i32, i32) {
    %c0_i32 = arith.constant 0 : i32
    %c0_i32_0 = arith.constant 0 : i32
    return %arg0, %c0_i32, %arg1 : i32, i32, i32
  }
  func.func @transform_1(%arg0: i32, %arg1: i32) -> (i32, i32, i32) {
    %c0_i32 = arith.constant 0 : i32
    %c0_i32_0 = arith.constant 0 : i32
    return %arg0, %c0_i32, %arg1 : i32, i32, i32
  }
  func.func @transform_2(%arg0: i32, %arg1: i32) -> (i32, i32, i32) {
    %c0_i32 = arith.constant 0 : i32
    %c0_i32_0 = arith.constant 0 : i32
    %c0_i32_1 = arith.constant 0 : i32
    return %arg0, %c0_i32, %c0_i32_0 : i32, i32, i32
  }
  func.func @transform_3(%arg0: i32, %arg1: i32) -> (i32, i32, i32) {
    %c0_i32 = arith.constant 0 : i32
    %c0_i32_0 = arith.constant 0 : i32
    %c0_i32_1 = arith.constant 0 : i32
    return %arg0, %c0_i32, %c0_i32_0 : i32, i32, i32
  }
  func.func @transform_4(%arg0: i32, %arg1: i32) -> (i32, i32, i32) {
    %c0_i32 = arith.constant 0 : i32
    %c0_i32_0 = arith.constant 0 : i32
    %c0_i32_1 = arith.constant 0 : i32
    return %arg0, %c0_i32, %c0_i32_0 : i32, i32, i32
  }
  func.func @transform_5(%arg0: i32, %arg1: i32) -> (i32, i32, i32) {
    %c0_i32 = arith.constant 0 : i32
    %c0_i32_0 = arith.constant 0 : i32
    %c0_i32_1 = arith.constant 0 : i32
    return %arg0, %c0_i32, %c0_i32_0 : i32, i32, i32
  }
}

</mosaic_0001>

<bundles_post_ra>
// kernel: combined_loss.1
= control target key start
LH: loop header
LB: loop body
LE: loop exit
PB: predicated region body
PF: predicated region fallthrough
CT: control target
= control target key end

     0   :  { %s735_s18 = smov 0   ;;  %s737_s19 = smov 0   ;;  %s817_s0 = inlined_call_operand.vmem [shape: f32[2,4,256], index: 0, kind: input, shape index: {}]   ;;  %s818_s1 = inlined_call_operand.vmem [shape: s32[2,1,256], index: 1, kind: input, shape index: {}]   ;;  %s819_s2 = inlined_call_operand.vmem [shape: f32[2,4,1], index: 2, kind: output, shape index: {0}]   ;;  %s820_s3 = inlined_call_operand.vmem [shape: f32[2,4,1], index: 3, kind: output, shape index: {1}]   ;;  %s821_s4 = inlined_call_operand.vmem [shape: f32[2,4,1], index: 4, kind: output, shape index: {2}]   ;;  %s822_s5 = inlined_call_operand.vmem [shape: f32[2,1,1], index: 5, kind: output, shape index: {3}]  }
   0x1   :  { %s739_s20 = smov 0  }
   0x2 LB: > { %s28_s21 = sadd.s32 1, %s698_s19  ;;  %p630_p0 = scmp.ge.s32.totalorder %s702_s20, 1  ;;  %s702_s20 = sphi %s739_s20, %s16_s20   ;;  %s698_s19 = sphi %s737_s19, %s824_s19   ;;  %s694_s18 = sphi %s735_s18, %s823_s18  }
   0x3   : > { %p30_p1 = scmp.ge.s32.totalorder %s28_s21, 2  ;;  %p229_p2 = scmp.lt.s32.totalorder %s702_s20, 3 }
   0x5   : > { %s826_s21 = smov (%p30_p1, %s28_s21), 0  ;;  %p230_p3 = pnand %p630_p0, %p229_p2 }
   0x6   : > { %p280_p4 = scmp.lt.s32.totalorder (!%p230_p3), %s694_s18, 1  ;;  %v325_v0 = vlaneseq (!%p230_p3)  ;;  %vm340_vm0 = vcmask (!%p230_p3), 1043456   ;;  %v704_v22 = vmov (!%p230_p3), 0.0   ;;  %vm317_vm3 = vcmask (!%p230_p3), 3072  }
   0x7   : > { %233 = sbr.rel (%p230_p3) target bundleno = 254 (0xfe), region = 28  ;;  %vm321_vm4 = vcmask (!%p230_p3), 0  }
   0x8   : > { %v326_v1 = vshrl.u32 (!%p230_p3), %v325_v0, 7 }
   0xa   : > { %v329_v5 = vsub.s32 (!%p230_p3), 0, %v326_v1  ;;  %v333_v6 = vsub.s32 (!%p230_p3), 1, %v326_v1 }
   0xe   : > { %s828_s18 = smov (!%p280_p4, %s694_s18), 1 }
   0xf   : > { %s641_s22 = sshll.u32 %s828_s18, 3  ;;  %s633_s23 = sshll.u32 %s828_s18, 1 }
  0x10   : > { %s287_s26 = scalar_lea.vmem %s817_s0, %s641_s22  ;;  %s296_s29 = scalar_lea.vmem %s818_s1, %s633_s23 }
  0x11   : > { %v323_v2 = vld [vmem:[%s287_s26] sm:$0xff]  ;;  %s634_s30 = sshll.u32 %s828_s18, 2  ;;  %s787_s11 = scalar_lea.vmem %s822_s5, %s828_s18 }
  0x12   : > { %v338_v3 = vcombine.high %v323_v2, %v323_v2  ;;  %v341_v4 = vsel %vm340_vm0, %v323_v2, -inf  ;;  %v324_v8 = vld [vmem:[%s296_s29] sm:$0x3]  ;;  %s301_s8 = scalar_lea.vmem %s819_s2, %s634_s30  ;;  %322 = vst.msk [vmem:[%s787_s11] sm:$0x1] %vm321_vm4, %v704_v22  ;;  %s309_s14 = scalar_lea.vmem %s821_s4, %s634_s30 }
  0x13   : > { %v342_v7 = vrot.slane %v341_v4, 4  ;;  %v330_v12 = vrot.slane %v324_v8, %v329_v5  ;;  %v334_v13 = vrot.slane %v324_v8, %v333_v6  ;;  %318 = vst.msk [vmem:[%s301_s8] sm:$0xf] %vm317_vm3, %v704_v22  ;;  %s305_s17 = scalar_lea.vmem %s820_s3, %s634_s30  ;;  %320 = vst.msk [vmem:[%s309_s14] sm:$0xf] %vm317_vm3, %v704_v22 }
  0x14   : > { %v348_v9 = vsel %vm340_vm0, %v338_v3, -inf  ;;  %319 = vst.msk [vmem:[%s305_s17] sm:$0xf] %vm317_vm3, %v704_v22 }
  0x15   : > { %v343_v10 = vmax.f32 %v341_v4, %v342_v7  ;;  %v349_v11 = vrot.slane %v348_v9, 4  ;;  %vm335_vm1 = vcmp.eq.s32.totalorder %v326_v1, %v330_v12  ;;  %vm336_vm2 = vcmp.eq.s32.totalorder %v326_v1, %v334_v13 }
  0x16   : > { %v637_v23 = vsel %vm335_vm1, 1.0, %v704_v22  ;;  %v638_v24 = vsel %vm336_vm2, 1.0, %v704_v22 }
  0x17   : > { %v344_v14 = vrot.slane %v343_v10, 2  ;;  %v350_v15 = vmax.f32 %v348_v9, %v349_v11  ;;  %v395_v27 = vcombine.low %v637_v23, %v638_v24  ;;  %v421_v58 = vsel %vm340_vm0, %v637_v23, 0.0 }
  0x18   : > { %v422_v59 = vsel %vm340_vm0, %v638_v24, 0.0 }
  0x19   : > { %v345_v16 = vmax.f32 %v343_v10, %v344_v14  ;;  %v351_v17 = vrot.slane %v350_v15, 2  ;;  %v423_v62 = vadd.f32 %v422_v59, %v421_v58 }
  0x1b   : > { %v346_v18 = vrot.slane %v345_v16, 1  ;;  %v352_v19 = vmax.f32 %v350_v15, %v351_v17  ;;  %v409_v22 = vld [vmem:[%s305_s17] sm:$0xf] }
  0x1d   : > { %v347_v20 = vmax.f32 %v345_v16, %v346_v18  ;;  %v353_v21 = vrot.slane %v352_v19, 1  ;;  %v420_v16 = vld [vmem:[%s309_s14] sm:$0xf] }
  0x1f   : > { %v354_v25 = vmax.f32 %v352_v19, %v353_v21  ;;  %v392_v19 = vld [vmem:[%s301_s8] sm:$0xf] }
  0x21   : > { %v357_v26 = vcombine.low %v347_v20, %v354_v25  ;;  %v432_v25 = vld [vmem:[%s787_s11] sm:$0x1] }
  0x23   : > { %v359_v28 = vsub.f32 %v323_v2, %v357_v26 }
  0x25   : > { %v436_v29 = vmul.f32 %v395_v27, %v359_v28  ;;  %v360_v30 = vmul.f32 1.442695, %v359_v28 }
  0x27   : > { %v438_v31 = vcombine.high %v436_v29, %v436_v29  ;;  %v440_v32 = vsel %vm340_vm0, %v436_v29, 0.0  ;;  %670 = vpow2.f32 %v360_v30 }
  0x29   : > { %v441_v33 = vsel %vm340_vm0, %v438_v31, 0.0 }
  0x2a   : > { %v442_v34 = vadd.f32 %v441_v33, %v440_v32 }
  0x2c   : > { %443 = vadd.xlane.f32.xlu0 %v442_v34 }
  0x31   : > { %v671_v35 = vpop.eup %670 }
  0x32   : > { %v363_v36 = vcombine.high %v671_v35, %v671_v35  ;;  %v365_v37 = vsel %vm340_vm0, %v671_v35, 0.0 }
  0x33   : > { %v366_v38 = vrot.slane %v365_v37, 4 }
  0x34   : > { %v372_v39 = vsel %vm340_vm0, %v363_v36, 0.0 }
  0x35   : > { %v367_v40 = vadd.f32 %v366_v38, %v365_v37  ;;  %v373_v41 = vrot.slane %v372_v39, 4 }
  0x37   : > { %v368_v42 = vrot.slane %v367_v40, 2  ;;  %v374_v43 = vadd.f32 %v373_v41, %v372_v39 }
  0x39   : > { %v369_v44 = vadd.f32 %v368_v42, %v367_v40  ;;  %v375_v45 = vrot.slane %v374_v43, 2 }
  0x3b   : > { %v370_v46 = vrot.slane %v369_v44, 1  ;;  %v376_v47 = vadd.f32 %v375_v45, %v374_v43 }
  0x3d   : > { %v371_v48 = vadd.f32 %v370_v46, %v369_v44  ;;  %v377_v49 = vrot.slane %v376_v47, 1 }
  0x3f   : > { %v378_v50 = vadd.f32 %v377_v49, %v376_v47  ;;  %672 = vrcp.f32 %v371_v48 }
  0x40   : > { %674 = vlog2.f32 %v371_v48 }
  0x41   : > { %676 = vlog2.f32 %v378_v50 }
  0x42   : > { %678 = vrcp.f32 %v378_v50 }
  0x49   : > { %v673_v51 = vpop.eup %672 }
  0x4a   : > { %v675_v52 = vpop.eup %674 }
  0x4b   : > { %v677_v53 = vpop.eup %676  ;;  %v429_v54 = vmul.f32 0.6931472, %v675_v52 }
  0x4c   : > { %v679_v55 = vpop.eup %678  ;;  %v431_v56 = vmul.f32 0.6931472, %v677_v53 }
  0x4d   : > { %v385_v57 = vcombine.low %v673_v51, %v679_v55 }
  0x4e   : > { %v433_v60 = vadd.f32 %v431_v56, %v429_v54 }
  0x4f   : > { %v387_v61 = vmul.f32 %v671_v35, %v385_v57 }
  0x50   : > { %434 = vadd.xlane.f32.xlu0 %v433_v60 }
  0x51   : > { %v397_v63 = vmul.f32 %v395_v27, %v387_v61  ;;  %v411_v0 = vcombine.high %v387_v61, %v387_v61  ;;  %v413_v4 = vsel %vm340_vm0, %v387_v61, 0.0 }
  0x53   : > { %v399_v1 = vcombine.high %v397_v63, %v397_v63  ;;  %v401_v2 = vsel %vm340_vm0, %v397_v63, 0.0  ;;  %v414_v5 = vsel %vm340_vm0, %v411_v0, 0.0 }
  0x54   : > { %424 = vadd.xlane.f32.xlu0 %v423_v62  ;;  %v415_v7 = vadd.f32 %v414_v5, %v413_v4 }
  0x55   : > { %v402_v3 = vsel %vm340_vm0, %v399_v1, 0.0 }
  0x56   : > { %v403_v6 = vadd.f32 %v402_v3, %v401_v2 }
  0x58   : > { %404 = vadd.xlane.f32.xlu1 %v403_v6 }
  0x5c   : > { %416 = vadd.xlane.f32.xlu1 %v415_v7 }
  0xb9   : > { %v444_v8 = vpop.xlane.xlu0 %443 }
  0xba   : > { %v445_v9 = vrot.slane %v444_v8, 4 }
  0xbc   : > { %v446_v10 = vadd.f32 %v445_v9, %v444_v8 }
  0xbe   : > { %v447_v11 = vrot.slane %v446_v10, 2 }
  0xc0   : > { %v448_v12 = vadd.f32 %v447_v11, %v446_v10 }
  0xc2   : > { %v449_v13 = vrot.slane %v448_v12, 1 }
  0xc4   : > { %v450_v14 = vadd.f32 %v449_v13, %v448_v12 }
  0xc6   : > { %642 = vpush %v450_v14 }
  0xdd   : > { %v435_v15 = vpop.xlane.xlu0 %434 }
  0xe1   : > { %v425_v17 = vpop.xlane.xlu0 %424 }
  0xe2   : > { %v426_v18 = vadd.f32 %v425_v17, %v420_v16 }
  0xe4   : > { %427 = vst.msk [vmem:[%s309_s14] sm:$0xf] %vm317_vm3, %v426_v18 }
  0xe5   : > { %v405_v20 = vpop.xlane.xlu1 %404 }
  0xe6   : > { %v406_v21 = vadd.f32 %v405_v20, %v392_v19 }
  0xe8   : > { %408 = vst.msk [vmem:[%s301_s8] sm:$0xf] %vm317_vm3, %v406_v21 }
  0xe9   : > { %v417_v23 = vpop.xlane.xlu1 %416 }
  0xea   : > { %v418_v24 = vadd.f32 %v417_v23, %v409_v22 }
  0xec   : > { %419 = vst.msk [vmem:[%s305_s17] sm:$0xf] %vm317_vm3, %v418_v24 }
  0xf7   : > { %s643_s18 = spop %642 }
  0xf8   : > { %v452_v26 = vstv %s643_s18 }
  0xf9   : > { %v453_v27 = vsub.f32 %v435_v15, %v452_v26 }
  0xfb   : > { %v454_v28 = vadd.f32 %v453_v27, %v432_v25 }
  0xfd   : > { %456 = vst.msk [vmem:[%s787_s11] sm:$0x1] %vm321_vm4, %v454_v28 }
  0xfe PF: > { %s16_s20 = sadd.s32 1, %s702_s20   ;;  %s823_s18 = smov %s698_s19 }
  0xff   : > { %p13_p5 = scmp.ge.s32.totalorder %s16_s20, 4   ;;  %s824_s19 = smov %s826_s21 }
 0x101   :  { %15 = sbr.rel (!%p13_p5) target bundleno = 2 (0x2), region = 101 }

</bundles_post_ra>
